<compile_context>
chip_gen: v7x
topology: tpu7x:2x2x1
jax: 0.10.0
libtpu: 0.0.40
codegen_flags: <defaults>
</compile_context>

<pallas_src>
import functools

import jax
import jax.numpy as jnp
from jax.experimental import pallas as pl
from jax.experimental.pallas import tpu as pltpu


def _prox_l1_kernel(x_ref, o_ref, *, sigma):
    # Pure elementwise clamp on the VPU (mem-bound; compute is filler).
    x = x_ref[...]
    o_ref[...] = jnp.maximum(jnp.minimum(x, sigma), -sigma).astype(o_ref.dtype)


def prox_l1(xk, sigma, *, lane=1024, max_tile_rows=512):
    """prox of sigma*||.||_1 conjugate: clamp(xk, -sigma, +sigma).

    xk: any-shaped array (NCHW in the reference module). sigma: python float.
    """
    orig_shape = xk.shape
    total = 1
    for d in orig_shape:
        total *= d

    flat = xk.reshape(-1)

    # Lane-dense 2-D view: (rows, lane), lane a multiple of 128.
    rows = pl.cdiv(total, lane)
    # Tile rows: multiple of 8 (sublane), capped at max_tile_rows.
    tile_rows = min(max_tile_rows, ((rows + 7) // 8) * 8)
    tile_rows = max(tile_rows, 8)
    # Pad so rows is an exact multiple of tile_rows (no partial blocks).
    rows_padded = pl.cdiv(rows, tile_rows) * tile_rows
    padded_total = rows_padded * lane
    if padded_total != total:
        flat = jnp.pad(flat, (0, padded_total - total))
    x2 = flat.reshape(rows_padded, lane)

    kernel = functools.partial(_prox_l1_kernel, sigma=float(sigma))

    out2 = pl.pallas_call(
        kernel,
        out_shape=jax.ShapeDtypeStruct((rows_padded, lane), xk.dtype),
        grid=(rows_padded // tile_rows,),
        in_specs=[pl.BlockSpec((tile_rows, lane), lambda i: (i, 0))],
        out_specs=pl.BlockSpec((tile_rows, lane), lambda i: (i, 0)),
        compiler_params=pltpu.CompilerParams(
            dimension_semantics=("parallel",)
        ),
    )(x2)

    return out2.reshape(-1)[:total].reshape(orig_shape)


if __name__ == "__main__":
    key = jax.random.PRNGKey(0)

    N, C, H, W = 2, 4, 16, 16
    sigma = 0.5  # module parameter (default 1.0 in the PyTorch __init__)

    xk = jax.random.normal(key, (N, C, H, W), dtype=jnp.float32)

    out = prox_l1(xk, sigma)
    out = jax.block_until_ready(out)

    # reference check in plain JAX (matches torch.maximum(torch.minimum(t1, xk), -t1))
    ref = jnp.maximum(jnp.minimum(xk, sigma), -sigma)
    assert out.shape == xk.shape
    assert jnp.allclose(out, ref, atol=0.0, rtol=0.0)

    print("KERNEL_OK")
</pallas_src>

<mosaic_0001>
module attributes {stable_mosaic.version = 11 : i64} {
  func.func @_prox_l1_kernel(%arg0: i32, %arg1: memref<8x1024xf32, #tpu.memory_space<vmem>>, %arg2: memref<8x1024xf32, #tpu.memory_space<vmem>>) attributes {dimension_semantics = [#tpu.dimension_semantics<parallel>], iteration_bounds = array<i64: 1>, scalar_prefetch = 0 : i64, scratch_operands = 0 : i64, tpu.core_type = #tpu.core_type<tc>, window_params = [{transform_indices = @transform_0, window_bounds = array<i64: 8, 1024>}, {transform_indices = @transform_1, window_bounds = array<i64: 8, 1024>}]} {
    %c0 = arith.constant 0 : index
    %c0_0 = arith.constant 0 : index
    %0 = vector.load %arg1[%c0, %c0_0] : memref<8x1024xf32, #tpu.memory_space<vmem>>, vector<8x1024xf32>
    %cst = arith.constant 5.000000e-01 : f32
    %1 = vector.broadcast %cst : f32 to vector<8x1024xf32>
    %2 = arith.minimumf %0, %1 : vector<8x1024xf32>
    %cst_1 = arith.constant -5.000000e-01 : f32
    %3 = vector.broadcast %cst_1 : f32 to vector<8x1024xf32>
    %4 = arith.maximumf %2, %3 : vector<8x1024xf32>
    %c0_2 = arith.constant 0 : index
    %c0_3 = arith.constant 0 : index
    %5 = vector.load %arg2[%c0_2, %c0_3] : memref<8x1024xf32, #tpu.memory_space<vmem>>, vector<8x1024xf32>
    tpu.vector_store %arg2[%c0_2, %c0_3], %4 {strides = array<i32>} : memref<8x1024xf32, #tpu.memory_space<vmem>>, vector<8x1024xf32>,
    return
  }
  func.func @transform_0(%arg0: i32) -> (i32, i32) {
    %c0_i32 = arith.constant 0 : i32
    %c0_i32_0 = arith.constant 0 : i32
    return %arg0, %c0_i32 : i32, i32
  }
  func.func @transform_1(%arg0: i32) -> (i32, i32) {
    %c0_i32 = arith.constant 0 : i32
    %c0_i32_0 = arith.constant 0 : i32
    return %arg0, %c0_i32 : i32, i32
  }
}

</mosaic_0001>

<bundles_post_ra>
// kernel: tpu_custom_call.1
= control target key start
LH: loop header
LB: loop body
LE: loop exit
PB: predicated region body
PF: predicated region fallthrough
CT: control target
= control target key end

     0   :  { %6 = vsyncpa [#allocation3], 0  ;;  %s162_s0 = inlined_call_operand.hbm [shape: f32[8,1024], index: 0, kind: input, shape index: {}]   ;;  %s163_s1 = inlined_call_operand.hbm [shape: f32[8,1024], index: 1, kind: output, shape index: {}]  }
   0x1   :  { %7 = vsyncpa [#allocation4], 0  ;;  %s126_s6 = smov [#allocation2]   ;;  %s78_s10 = scalar_lea.hbm %s162_s0, 1024 }
   0x2   :  { %s14_s7 = sshll.u32 %s126_s6, 4  ;;  %p79_p0 = scmp.ne.s32.totalorder %s162_s0, %s78_s10  ;;  %s15_s7 = int_to_ptr.vmem [resolvable:$true] %s14_s7 }
   0x3   :  { %p82_p1 = scmp.lt.u32.totalorder %s78_s10, %s162_s0 }
   0x5   :  { %p84_p2 = pnand %p82_p1, %p79_p0 }
   0x7   :  { %87 = shalt.err (!%p84_p2)
}
   0x8   :  { %s88_s15 = scalar_lea.vmem %s15_s7, 1024  ;;  %p93_p4 = scmp.lt.s32.totalorder %s15_s7, %s15_s7 }
   0x9   :  { %p89_p3 = scmp.ne.s32.totalorder %s15_s7, %s88_s15  ;;  %p94_p5 = scmp.lt.s32.totalorder %s88_s15, %s88_s15 }
   0xb   :  { %p95_p6 = por %p94_p5, %p93_p4 }
   0xd   :  { %p96_p7 = pnand %p95_p6, %p89_p3 }
   0xf   :  { %99 = shalt.err (!%p96_p7)
}
  0x10   :  { %17 = dma.hbm_to_vmem [thread:$0]  %s162_s0, 1024, %s15_s7, [#allocation3]  }
  0x11   :  { %122 = dma.done.wait [#allocation3], 1024  }
  0x12   :  { %123 = vsyncadd [#allocation3], 4294966272  ;;  %v21_v0 = vld [vmem:[#allocation2] sm:$0xff]  ;;  %v22_v1 = vld [vmem:[#allocation2 + $0x8] sm:$0xff]  ;;  %s127_s18 = smov [#allocation5]  }
  0x13   :  { %v23_v2 = vld [vmem:[#allocation2 + $0x10] sm:$0xff]  ;;  %s59_s19 = sshll.u32 %s127_s18, 4  ;;  %v68_v3 = vclamps-f32 %v21_v0, 0.5  ;;  %v69_v4 = vclamps-f32 %v22_v1, 0.5  ;;  %v24_v6 = vld [vmem:[#allocation2 + $0x18] sm:$0xff]  ;;  %v25_v7 = vld [vmem:[#allocation2 + $0x20] sm:$0xff]  ;;  %s60_s19 = int_to_ptr.vmem [resolvable:$true] %s59_s19 }
  0x14   :  { %v70_v5 = vclamps-f32 %v23_v2, 0.5  ;;  %v26_v8 = vld [vmem:[#allocation2 + $0x28] sm:$0xff]  ;;  %v71_v9 = vclamps-f32 %v24_v6, 0.5  ;;  %v72_v10 = vclamps-f32 %v25_v7, 0.5  ;;  %v27_v12 = vld [vmem:[#allocation2 + $0x30] sm:$0xff]  ;;  %v28_v13 = vld [vmem:[#allocation2 + $0x38] sm:$0xff]  ;;  %p105_p9 = scmp.lt.s32.totalorder %s60_s19, %s60_s19 }
  0x15   :  { %v73_v11 = vclamps-f32 %v26_v8, 0.5  ;;  %45 = vst [vmem:[#allocation5] sm:$0xff] %v68_v3  ;;  %46 = vst [vmem:[#allocation5 + $0x8] sm:$0xff] %v69_v4  ;;  %v74_v14 = vclamps-f32 %v27_v12, 0.5  ;;  %v75_v15 = vclamps-f32 %v28_v13, 0.5  ;;  %s100_s0 = scalar_lea.vmem %s60_s19, 1024 }
  0x16   :  { %47 = vst [vmem:[#allocation5 + $0x10] sm:$0xff] %v70_v5  ;;  %48 = vst [vmem:[#allocation5 + $0x18] sm:$0xff] %v71_v9  ;;  %p101_p8 = scmp.ne.s32.totalorder %s60_s19, %s100_s0  ;;  %p106_p10 = scmp.lt.s32.totalorder %s100_s0, %s100_s0 }
  0x17   :  { %49 = vst [vmem:[#allocation5 + $0x20] sm:$0xff] %v72_v10  ;;  %50 = vst [vmem:[#allocation5 + $0x28] sm:$0xff] %v73_v11 }
  0x18   :  { %51 = vst [vmem:[#allocation5 + $0x30] sm:$0xff] %v74_v14  ;;  %52 = vst [vmem:[#allocation5 + $0x38] sm:$0xff] %v75_v15  ;;  %p107_p11 = por %p106_p10, %p105_p9 }
  0x1a   :  { %p108_p12 = pnand %p107_p11, %p101_p8 }
  0x1c   :  { %111 = shalt.err (!%p108_p12)
}
  0x1d   :  { %s112_s22 = scalar_lea.hbm %s163_s1, 1024 }
  0x1e   :  { %p113_p13 = scmp.ne.s32.totalorder %s163_s1, %s112_s22  ;;  %p116_p0 = scmp.lt.u32.totalorder %s112_s22, %s163_s1 }
  0x20   :  { %p118_p1 = pnand %p116_p0, %p113_p13 }
  0x22   :  { %121 = shalt.err (!%p118_p1)
}
  0x23   :  { %62 = dma.vmem_to_hbm [thread:$0]  %s60_s19, 1024, %s163_s1, [#allocation4]  }
  0x24   :  { %124 = dma.done.wait [#allocation4], 1024  }
  0x25   :  { %125 = vsyncadd [#allocation4], 4294966272 }
  0x26   :  { %66 = vsyncpa [#allocation3], 1 }
  0x27   :  { %67 = vsyncpa [#allocation4], 1 }

</bundles_post_ra>
